<compile_context>
chip_gen: v7x
topology: tpu7x:2x2x1
jax: 0.10.0
libtpu: 0.0.40
codegen_flags: <defaults>
</compile_context>

<pallas_src>
import functools

import jax
import jax.numpy as jnp
from jax.experimental import pallas as pl
from jax.experimental.pallas import tpu as pltpu

_ROWS = 8     # sublane rows of the packed slab (one native f32 tile row-group)
_LANE = 128   # lane width


def _round_up(x: int, m: int) -> int:
    return -(-x // m) * m


def _negll_kernel(slab_ref, out_ref, acc_ref, *, inv_n):
    j = pl.program_id(1)

    @pl.when(j == 0)
    def _init():
        acc_ref[...] = jnp.zeros_like(acc_ref)

    mu_x = slab_ref[0:1, :]          # (1, block)
    mu_y = slab_ref[1:2, :]
    y_x = slab_ref[2:3, :]
    y_y = slab_ref[3:4, :]
    sigma = slab_ref[4:5, :]

    dx = y_x - mu_x
    dy = y_y - mu_y
    sq = dx * dx + dy * dy                        # per-batch ||y - mu||^2 (the 1x2 "bmm")

    var = sigma * sigma
    inv_var = pl.reciprocal(var)                  # EUP; exact (approx=True drifts ~1e-3)
    terms = jnp.log(var) + 0.5 * sq * inv_var     # (1, block)

    # one cross-lane reduce per tile, accumulate the running sum in f32
    acc_ref[...] += jnp.sum(terms, axis=1, keepdims=True)   # (1, 1)

    @pl.when(j == pl.num_programs(1) - 1)
    def _finalize():
        # write this split's partial mean, broadcast over a lane-dense (8,128) block
        out_ref[...] = jnp.broadcast_to(acc_ref[...] * inv_n, out_ref.shape)


def neg_ll_loss(mu_pred, sigma_pred, y_true, *, block_b=16384, num_splits=2):
    """mu_pred (B,1,2), sigma_pred (B,1,1)/(B,1), y_true (B,1,2) -> scalar f32 loss."""
    B = mu_pred.shape[0]
    f32 = jnp.float32
    # TODO(synk): if the producing model emits bf16, pack the slab in bf16 and upcast
    # inside the kernel to halve HBM traffic (keep the accumulation in f32).
    mu2 = mu_pred.reshape(B, 2).astype(f32)
    y2 = y_true.reshape(B, 2).astype(f32)
    sig = sigma_pred.reshape(B, 1).astype(f32)

    # ---- tiling over the batch (lane) axis ----
    per_split = _round_up(max(1, -(-B // num_splits)), _LANE)
    tiles = -(-per_split // block_b)                   # tiles per split
    block = _round_up(-(-per_split // tiles), _LANE)   # lane width of one tile
    per_split = tiles * block
    Bp = num_splits * per_split

    # ---- pack everything into a single lane-dense slab (8, Bp) ----
    data = jnp.concatenate([mu2, y2, sig], axis=1)                        # (B, 5)
    data = jnp.pad(data, ((0, 0), (0, _ROWS - 5)), constant_values=1.0)   # (B, 8)
    # pad lanes with mu = y = 1 (diff 0) and sigma = 1 (log var = 0): contribute 0
    slab = jnp.pad(data, ((0, Bp - B), (0, 0)), constant_values=1.0).T    # (8, Bp)

    kernel = functools.partial(_negll_kernel, inv_n=1.0 / B)

    out = pl.pallas_call(
        kernel,
        out_shape=jax.ShapeDtypeStruct((num_splits * _ROWS, _LANE), f32),
        grid_spec=pltpu.PrefetchScalarGridSpec(
            num_scalar_prefetch=0,
            grid=(num_splits, tiles),
            in_specs=[
                pl.BlockSpec((_ROWS, block), lambda i, j: (0, i * tiles + j)),
            ],
            out_specs=pl.BlockSpec((_ROWS, _LANE), lambda i, j: (i, 0)),
            scratch_shapes=[pltpu.VMEM((1, 1), f32)],
        ),
        compiler_params=pltpu.CompilerParams(
            dimension_semantics=("parallel", "arbitrary"),
        ),
    )(slab)

    # each split wrote (partial_sum / B) broadcast over its own (8,128) block
    return jnp.sum(out[::_ROWS, 0])


if __name__ == "__main__":
    key = jax.random.PRNGKey(0)
    k1, k2, k3 = jax.random.split(key, 3)

    B = 8
    mu_pred = jax.random.normal(k1, (B, 1, 2), dtype=jnp.float32)
    y_true = jax.random.normal(k2, (B, 1, 2), dtype=jnp.float32)
    # strictly positive std-devs
    sigma_pred = jax.nn.softplus(jax.random.normal(k3, (B, 1, 1), dtype=jnp.float32)) + 0.1

    loss = jax.block_until_ready(neg_ll_loss(mu_pred, sigma_pred, y_true))

    # pure-JAX reference (same math as the torch module)
    diff = (y_true - mu_pred).reshape(B, 2)
    sq = jnp.sum(diff * diff, axis=-1, keepdims=True)
    var = sigma_pred.reshape(B, 1) ** 2
    ref = jnp.mean(jnp.log(var) + 0.5 * sq / var)
    assert jnp.allclose(loss, ref, rtol=1e-5, atol=1e-5), (loss, ref)

    print("KERNEL_OK")
</pallas_src>

<mosaic_0001>
module attributes {stable_mosaic.version = 11 : i64} {
  func.func @_negll_kernel(%arg0: i32, %arg1: i32, %arg2: memref<8x128xf32, #tpu.memory_space<vmem>>, %arg3: memref<8x128xf32, #tpu.memory_space<vmem>>, %arg4: memref<1x1xf32, #tpu.memory_space<vmem>>) attributes {dimension_semantics = [#tpu.dimension_semantics<parallel>, #tpu.dimension_semantics<arbitrary>], iteration_bounds = array<i64: 2, 1>, scalar_prefetch = 0 : i64, scratch_operands = 1 : i64, tpu.core_type = #tpu.core_type<tc>, window_params = [{transform_indices = @transform_0, window_bounds = array<i64: 8, 128>}, {transform_indices = @transform_1, window_bounds = array<i64: 8, 128>}]} {
    %c0_i32 = arith.constant 0 : i32
    %0 = arith.cmpi eq, %arg1, %c0_i32 : i32
    %1 = arith.extui %0 : i1 to i32
    %c0_i32_0 = arith.constant 0 : i32
    %2 = arith.cmpi ne, %1, %c0_i32_0 : i32
    scf.if %2 {
      %cst_13 = arith.constant 0.000000e+00 : f32
      %28 = vector.broadcast %cst_13 : f32 to vector<1x1xf32>
      %c0_14 = arith.constant 0 : index
      %c0_15 = arith.constant 0 : index
      %29 = vector.load %arg4[%c0_14, %c0_15] : memref<1x1xf32, #tpu.memory_space<vmem>>, vector<1x1xf32>
      tpu.vector_store %arg4[%c0_14, %c0_15], %28 {strides = array<i32>} : memref<1x1xf32, #tpu.memory_space<vmem>>, vector<1x1xf32>,
    } else {
    }
    %c0 = arith.constant 0 : index
    %c0_1 = arith.constant 0 : index
    %3 = vector.load %arg2[%c0, %c0_1] : memref<8x128xf32, #tpu.memory_space<vmem>>, vector<1x128xf32>
    %c1 = arith.constant 1 : index
    %c0_2 = arith.constant 0 : index
    %4 = vector.load %arg2[%c1, %c0_2] : memref<8x128xf32, #tpu.memory_space<vmem>>, vector<1x128xf32>
    %c2 = arith.constant 2 : index
    %c0_3 = arith.constant 0 : index
    %5 = vector.load %arg2[%c2, %c0_3] : memref<8x128xf32, #tpu.memory_space<vmem>>, vector<1x128xf32>
    %c3 = arith.constant 3 : index
    %c0_4 = arith.constant 0 : index
    %6 = vector.load %arg2[%c3, %c0_4] : memref<8x128xf32, #tpu.memory_space<vmem>>, vector<1x128xf32>
    %c4 = arith.constant 4 : index
    %c0_5 = arith.constant 0 : index
    %7 = vector.load %arg2[%c4, %c0_5] : memref<8x128xf32, #tpu.memory_space<vmem>>, vector<1x128xf32>
    %8 = arith.subf %5, %3 : vector<1x128xf32>
    %9 = arith.subf %6, %4 : vector<1x128xf32>
    %10 = arith.mulf %8, %8 : vector<1x128xf32>
    %11 = arith.mulf %9, %9 : vector<1x128xf32>
    %12 = arith.addf %10, %11 : vector<1x128xf32>
    %13 = arith.mulf %7, %7 : vector<1x128xf32>
    %14 = tpu.reciprocal %13 : vector<1x128xf32> -> vector<1x128xf32>
    %15 = math.log %13 : vector<1x128xf32>
    %cst = arith.constant 5.000000e-01 : f32
    %16 = vector.broadcast %cst : f32 to vector<1x128xf32>
    %17 = arith.mulf %16, %12 : vector<1x128xf32>
    %18 = arith.mulf %17, %14 : vector<1x128xf32>
    %19 = arith.addf %15, %18 : vector<1x128xf32>
    %c0_6 = arith.constant 0 : index
    %c0_7 = arith.constant 0 : index
    %20 = vector.load %arg4[%c0_6, %c0_7] : memref<1x1xf32, #tpu.memory_space<vmem>>, vector<1x1xf32>
    %cst_8 = arith.constant dense<0.000000e+00> : vector<1xf32>
    %21 = vector.multi_reduction <add>, %19, %cst_8 [1] : vector<1x128xf32> to vector<1xf32>
    %22 = vector.shape_cast %21 : vector<1xf32> to vector<1x1xf32>
    %23 = arith.addf %20, %22 : vector<1x1xf32>
    %c0_9 = arith.constant 0 : index
    %c0_10 = arith.constant 0 : index
    %24 = vector.load %arg4[%c0_9, %c0_10] : memref<1x1xf32, #tpu.memory_space<vmem>>, vector<1x1xf32>
    tpu.vector_store %arg4[%c0_9, %c0_10], %23 {strides = array<i32>} : memref<1x1xf32, #tpu.memory_space<vmem>>, vector<1x1xf32>,
    %c0_i32_11 = arith.constant 0 : i32
    %25 = arith.cmpi eq, %arg1, %c0_i32_11 : i32
    %26 = arith.extui %25 : i1 to i32
    %c0_i32_12 = arith.constant 0 : i32
    %27 = arith.cmpi ne, %26, %c0_i32_12 : i32
    scf.if %27 {
      %c0_13 = arith.constant 0 : index
      %c0_14 = arith.constant 0 : index
      %28 = vector.load %arg4[%c0_13, %c0_14] : memref<1x1xf32, #tpu.memory_space<vmem>>, vector<1x1xf32>
      %cst_15 = arith.constant 1.250000e-01 : f32
      %29 = vector.broadcast %cst_15 : f32 to vector<1x1xf32>
      %30 = arith.mulf %28, %29 : vector<1x1xf32>
      %31 = vector.shape_cast %30 : vector<1x1xf32> to vector<1x1xf32>
      %32 = vector.broadcast %31 : vector<1x1xf32> to vector<8x128xf32>
      %c0_16 = arith.constant 0 : index
      %c0_17 = arith.constant 0 : index
      %33 = vector.load %arg3[%c0_16, %c0_17] : memref<8x128xf32, #tpu.memory_space<vmem>>, vector<8x128xf32>
      tpu.vector_store %arg3[%c0_16, %c0_17], %32 {strides = array<i32>} : memref<8x128xf32, #tpu.memory_space<vmem>>, vector<8x128xf32>,
    } else {
    }
    return
  }
  func.func @transform_0(%arg0: i32, %arg1: i32) -> (i32, i32) {
    %c1_i32 = arith.constant 1 : i32
    %0 = arith.muli %arg0, %c1_i32 : i32
    %1 = arith.addi %0, %arg1 : i32
    %c0_i32 = arith.constant 0 : i32
    %c0_i32_0 = arith.constant 0 : i32
    return %c0_i32, %1 : i32, i32
  }
  func.func @transform_1(%arg0: i32, %arg1: i32) -> (i32, i32) {
    %c0_i32 = arith.constant 0 : i32
    %c0_i32_0 = arith.constant 0 : i32
    return %arg0, %c0_i32 : i32, i32
  }
}

</mosaic_0001>

<bundles_post_ra>
// kernel: tpu_custom_call.1
= control target key start
LH: loop header
LB: loop body
LE: loop exit
PB: predicated region body
PF: predicated region fallthrough
CT: control target
= control target key end

     0   :  { %6 = vsyncpa [#allocation4], 0  ;;  %s675_s0 = inlined_call_operand.hbm [shape: f32[8,256], index: 0, kind: input, shape index: {}]   ;;  %s676_s1 = inlined_call_operand.hbm [shape: f32[16,128], index: 1, kind: output, shape index: {}]  }
   0x1   :  { %8 = vsyncpa [#allocation4 + $0x1], 0 }
   0x2   :  { %9 = vsyncpa [#allocation5], 0 }
   0x3   :  { %11 = vsyncpa [#allocation5 + $0x1], 0  ;;  %s497_s6 = smov 0   ;;  %s499_s7 = smov 0  }
   0x4   :  { %s501_s8 = smov 0   ;;  %s503_s9 = smov 0  }
   0x5   :  { %s505_s10 = smov 0   ;;  %s507_s11 = smov 0  }
   0x6 LB: > { %s287_s12 = sadd.s32 4294967295, %s481_s11   ;;  %s288_s13 = sadd.s32 4294967294, %s481_s11   ;;  %s481_s11 = sphi %s507_s11, %s17_s11   ;;  %s477_s10 = sphi %s505_s10, %s692_s10   ;;  %s473_s9 = sphi %s503_s9, %s691_s9   ;;  %s469_s8 = sphi %s501_s8, %s690_s8   ;;  %s465_s7 = sphi %s499_s7, %s689_s7   ;;  %s461_s6 = sphi %s497_s6, %s688_s6  }
   0x7   : > { %s29_s14 = sadd.s32 1, %s477_s10  ;;  %s38_s15 = sadd.s32 1, %s469_s8 }
   0x8   : > { %p31_p0 = scmp.ge.s32.totalorder %s29_s14, 2  ;;  %p45_p1 = scmp.ne.s32.totalorder %s469_s8, %s465_s7 }
   0x9   : > { %p46_p2 = scmp.eq.s32.totalorder %s481_s11, 0  ;;  %p51_p3 = scmp.ne.s32.totalorder %s465_s7, %s461_s6 }
   0xa   : > { %s694_s14 = smov (%p31_p0, %s29_s14), 0  ;;  %p52_p5 = scmp.eq.s32.totalorder %s287_s12, 0 }
   0xb   : > { %p538_p4 = por %p46_p2, %p45_p1  ;;  %s35_s17 = ssub.s32 %s477_s10, %s694_s14 }
   0xc   : > { %p75_p6 = scmp.eq.s32.totalorder %s287_s12, 1  ;;  %p36_p7 = scmp.eq.s32.totalorder %s35_s17, 0 }
   0xd   : > { %p544_p8 = por %p52_p5, %p51_p3  ;;  %p81_p10 = scmp.eq.s32.totalorder %s288_s13, 1 }
   0xe   : > { %p548_p9 = por %p75_p6, %p45_p1  ;;  %p312_p13 = scmp.lt.s32.totalorder %s481_s11, 2 }
   0xf   : > { %s553_s20 = scalar_select %p36_p7, %s469_s8, %s38_s15  }
  0x10   : > { %s680_s19 = scalar_select %p548_p9, 1, 0 }
  0x11   : > { %p555_p11 = por %p81_p10, %p51_p3  ;;  %s101_s22 = sand.u32 1, %s469_s8  }
  0x12   : > { %s291_s23 = sshll.u32 %s101_s22, 3  ;;  %s292_s24 = sshll.u32 %s477_s10, 7 }
  0x13   : > { %s681_s21 = scalar_select %p555_p11, 1, 0 }
  0x14   : > { %s566_s27 = scalar_lea.hbm %s675_s0, %s292_s24  ;;  %s105_s28 = scalar_lea.vmem [#allocation3], %s291_s23 }
  0x15   : > { %s113_s29 = sshll.u32 %s105_s28, 4  ;;  %p572_p0 = pnand %p312_p13, %p538_p4  ;;  %s568_s29 = int_to_ptr.vmem [resolvable:$true] %s113_s29 }
  0x16   : > { %s102_s2 = scalar_lea.sflag [#allocation4], %s101_s22  ;;  %s369_s3 = scalar_lea.hbm %s566_s27, 128 }
  0x17   : > { %p370_p3 = scmp.ne.s32.totalorder %s566_s27, %s369_s3  ;;  %p371_p5 = pneg %p572_p0 }
  0x18   : > { %s374_s12 = scalar_lea.hbm %s675_s0, 256  ;;  %p375_p4 = scmp.lt.u32.totalorder %s566_s27, %s675_s0 }
  0x19   : > { %p372_p6 = pnand %p371_p5, %p370_p3  ;;  %p376_p10 = scmp.lt.u32.totalorder %s374_s12, %s369_s3 }
  0x1a   : > { %p378_p12 = scmp.lt.u32.totalorder %s369_s3, %s566_s27 }
  0x1b   : > { %p373_p7 = pneg %p372_p6  ;;  %p377_p13 = por %p376_p10, %p375_p4 }
  0x1d   : > { %p379_p1 = por %p378_p12, %p377_p13 }
  0x1f   : > { %p380_p2 = pnand %p379_p1, %p373_p7 }
  0x21   : > { %383 = shalt.err (!%p380_p2)
}
  0x22   : > { %s384_s16 = scalar_lea.vmem %s568_s29, 128  ;;  %s483_s17 = smov [#allocation3]  }
  0x23   : > { %p385_p3 = scmp.ne.s32.totalorder %s568_s29, %s384_s16  ;;  %s389_s22 = sshll.u32 %s483_s17, 4  ;;  %s390_s22 = int_to_ptr.vmem [resolvable:$false] %s389_s22 }
  0x24   : > { %s391_s23 = scalar_lea.vmem %s390_s22, 256  ;;  %p392_p9 = scmp.lt.s32.totalorder %s568_s29, %s390_s22 }
  0x25   : > { %p387_p6 = pnand %p385_p3, %p371_p5  ;;  %p393_p4 = scmp.lt.s32.totalorder %s391_s23, %s384_s16 }
  0x27   : > { %p388_p11 = pneg %p387_p6  ;;  %p394_p10 = por %p393_p4, %p392_p9 }
  0x29   : > { %p395_p12 = pnand %p394_p10, %p388_p11 }
  0x2b   : > { %398 = shalt.err (!%p395_p12)
}
  0x2c   : > { %307 = dma.hbm_to_vmem [thread:$0]  (!%p572_p0), %s566_s27, 128, %s568_s29, %s102_s2  }
  0x2d   : > { %p683_p1 = scmp.lt.s32.totalorder %s481_s11, 3  ;;  %p684_p2 = scmp.ge.s32.totalorder %s481_s11, 1 }
  0x2f   : > { %p119_p5 = pnand %p684_p2, %p683_p1 }
  0x30   : > { %s608_s24 = sand.u32 (!%p119_p5), 1, %s465_s7  }
  0x31   : > { %122 = sbr.rel (%p119_p5) target bundleno = 377 (0x179), region = 24  ;;  %s294_s25 = sshll.u32 (!%p119_p5), %s608_s24, 3 }
  0x32   : > { %s125_s26 = scalar_lea.sflag (!%p119_p5), [#allocation4], %s608_s24  ;;  %s128_s28 = scalar_lea.vmem (!%p119_p5), [#allocation3], %s294_s25 }
  0x38   : > { %452 = dma.done.wait (%p544_p8), %s125_s26, 128  }
  0x39   : > { %454 = vsyncadd (%p544_p8), %s125_s26, 4294967168  ;;  %vm152_vm0 = vcmask 0   ;;  %v484_v0 = vmov 0.0   ;;  %v154_v1 = vld [vmem:[%s128_s28] sm:$0x1]  ;;  %vm172_vm1 = vcmask 1040384   ;;  %v185_v23 = vlaneseq }
  0x3a   : > { %153 = vst.msk [vmem:[#allocation2] sm:$0x1] %vm152_vm0, %v484_v0  ;;  %v155_v2 = vld [vmem:[%s128_s28 + $0x1] sm:$0x1]  ;;  %v156_v3 = vld [vmem:[%s128_s28 + $0x2] sm:$0x1] }
  0x3b   : > { %v157_v4 = vld [vmem:[%s128_s28 + $0x3] sm:$0x1]  ;;  %v158_v5 = vld [vmem:[%s128_s28 + $0x4] sm:$0x1]  ;;  %v159_v6 = vsub.f32 %v156_v3, %v154_v1  ;;  %v485_v19 = vmov 0   ;;  %v186_v24 = vshrl.u32 %v185_v23, 7 }
  0x3c   : > { %v160_v7 = vsub.f32 %v157_v4, %v155_v2  ;;  %v164_v8 = vmul.f32 %v158_v5, %v158_v5  ;;  %364 = vset.pattern.permute.xlu0 %v485_v19  ;;  %s146_s18 = scalar_lea.vmem [#allocation6], %s294_s25  ;;  %s297_s29 = sshll.u32 %s473_s9, 7 }
  0x3d   : > { %v161_v9 = vmul.f32 %v159_v6, %v159_v6  ;;  %v187_v25 = vsub.s32 0, %v186_v24  ;;  %s208_s27 = sshll.u32 %s146_s18, 4  ;;  %s628_s3 = scalar_lea.hbm %s676_s1, %s297_s29  ;;  %s623_s27 = int_to_ptr.vmem [resolvable:$true] %s208_s27 }
  0x3e   : > { %v162_v10 = vmul.f32 %v160_v7, %v160_v7  ;;  %365 = vrcp.f32 %v164_v8  ;;  %s195_s4 = scalar_lea.sflag [#allocation5], %s608_s24  ;;  %s399_s5 = scalar_lea.vmem %s623_s27, 128 }
  0x3f   : > { %367 = vlog2.f32 %v164_v8  ;;  %p400_p8 = scmp.ne.s32.totalorder %s623_s27, %s399_s5  ;;  %p685_p9 = scmp.ne.s32.totalorder %s680_s19, 0 }
  0x40   : > { %v163_v11 = vadd.f32 %v162_v10, %v161_v9  ;;  %s486_s12 = smov [#allocation6]  }
  0x41   : > { %v171_v20 = vld [vmem:[#allocation2] sm:$0x1]  ;;  %p401_p11 = pnand %p400_p8, %p685_p9  ;;  %s403_s9 = sshll.u32 %s486_s12, 4  ;;  %s404_s9 = int_to_ptr.vmem [resolvable:$false] %s403_s9 }
  0x42   : > { %v168_v12 = vmul.f32 0.5, %v163_v11  ;;  %s405_s13 = scalar_lea.vmem %s404_s9, 256  ;;  %p406_p7 = scmp.lt.s32.totalorder %s623_s27, %s404_s9 }
  0x43   : > { %p402_p0 = pneg %p401_p11  ;;  %p407_p13 = scmp.lt.s32.totalorder %s405_s13, %s399_s5 }
  0x45   : > { %p408_p3 = por %p407_p13, %p406_p7 }
  0x47   : > { %p409_p6 = pnand %p408_p3, %p402_p0 }
  0x48   : > { %v366_v13 = vpop.eup %365 }
  0x49   : > { %v368_v14 = vpop.eup %367  ;;  %v169_v15 = vmul.f32 %v366_v13, %v168_v12 }
  0x4a   : > { %v167_v16 = vmul.f32 0.6931472, %v368_v14 }
  0x4c   : > { %v170_v17 = vadd.f32 %v169_v15, %v167_v16 }
  0x4e   : > { %v173_v18 = vsel %vm172_vm1, %v170_v17, 0.0 }
  0x4f   : > { %174 = vadd.xlane.f32.xlu0 %v173_v18 }
  0xdc   : > { %v175_v21 = vpop.xlane.xlu0 %174 }
  0xdd   : > { %v176_v22 = vadd.f32 %v175_v21, %v171_v20 }
  0xdf   : > { %178 = vst.msk [vmem:[#allocation2] sm:$0x1] %vm152_vm0, %v176_v22 }
  0xe6   : > { %v182_v26 = vld [vmem:[#allocation2] sm:$0x1] }
  0xe7   : > { %v183_v27 = vmul.f32 0.125, %v182_v26 }
  0xe9   : > { %v188_v28 = vrot.slane %v183_v27, %v187_v25 }
  0xeb   : > { %190 = vperm.xlu0 %364, %v188_v28  }
 0x16a   : > { %v191_v29 = vpop.permute.xlu0 %190 }
 0x16b   : > { %193 = vst [vmem:[%s146_s18] sm:$0xff] %v191_v29 }
 0x16c   : > { %412 = shalt.err (!%p409_p6)
}
 0x16d   : > { %s413_s15 = scalar_lea.hbm %s628_s3, 128  ;;  %s417_s22 = scalar_lea.hbm %s676_s1, 256 }
 0x16e   : > { %p414_p4 = scmp.ne.s32.totalorder %s628_s3, %s413_s15  ;;  %p418_p1 = scmp.lt.u32.totalorder %s628_s3, %s676_s1 }
 0x16f   : > { %p419_p2 = scmp.lt.u32.totalorder %s417_s22, %s413_s15  ;;  %p421_p8 = scmp.lt.u32.totalorder %s413_s15, %s628_s3 }
 0x170   : > { %p415_p10 = pnand %p414_p4, %p685_p9 }
 0x171   : > { %p420_p5 = por %p419_p2, %p418_p1 }
 0x172   : > { %p416_p12 = pneg %p415_p10 }
 0x173   : > { %p422_p11 = por %p421_p8, %p420_p5 }
 0x175   : > { %p423_p0 = pnand %p422_p11, %p416_p12 }
 0x177   : > { %426 = shalt.err (!%p423_p0)
}
 0x178   : > { %302 = dma.vmem_to_hbm [thread:$0]  (%p685_p9), %s623_s27, 128, %s628_s3, %s195_s4  }
 0x179 PF: > { %s220_s25 = sand.u32 1, %s461_s6   ;;  %p686_p7 = scmp.ne.s32.totalorder %s681_s21, 0 }
 0x17a   : > { %p687_p13 = scmp.ge.s32.totalorder %s481_s11, 2  ;;  %s221_s26 = scalar_lea.sflag [#allocation5], %s220_s25 }
 0x17c   : > { %p309_p3 = pnand %p687_p13, %p686_p7 }
 0x17e   : > { %456 = dma.done.wait (!%p309_p3), %s221_s26, 128  }
 0x17f   : > { %458 = vsyncadd (!%p309_p3), %s221_s26, 4294967168  ;;  %s17_s11 = sadd.s32 1, %s481_s11   ;;  %s688_s6 = smov %s465_s7 }
 0x180   : > { %p14_p6 = scmp.ge.s32.totalorder %s17_s11, 4   ;;  %s689_s7 = smov %s469_s8 }
 0x181   : > { %s690_s8 = smov %s553_s20  ;;  %s691_s9 = smov %s477_s10 }
 0x182   : > { %s692_s10 = smov %s694_s14  ;;  %16 = sbr.rel (!%p14_p6) target bundleno = 6 (0x6), region = 77 }
 0x189   :  { %226 = vsyncpa [#allocation4], 1 }
 0x18a   :  { %228 = vsyncpa [#allocation4 + $0x1], 1 }
 0x18b   :  { %229 = vsyncpa [#allocation5], 1 }
 0x18c   :  { %231 = vsyncpa [#allocation5 + $0x1], 1 }

</bundles_post_ra>
